<compile_context>
chip_gen: v6e
topology: v6e:2x2x1
jax: 0.10.0
libtpu: 0.0.40
codegen_flags: <defaults>
</compile_context>

<pallas_src>
import functools

import jax
import jax.numpy as jnp
from jax import lax
from jax.experimental import pallas as pl
from jax.experimental.pallas import tpu as pltpu


def _xent_kernel(pred_ref, lbl_ref, out_ref, acc_ref, *, pixels, tile_p, need_mask):
    """Grid = (N images, pixel tiles).  One step = one (C, TP) block of logits.

    pred_ref : (1, C, TP)  logits for `TP` pixels of image `i` (pixels on lanes)
    lbl_ref  : (1, 1, TP)  int32 class labels for the same pixels
    out_ref  : (1, 1, 1)   per-image NLL sum (written on the last pixel tile)
    acc_ref  : (1, TP)     f32 VMEM partial-sum accumulator (per image)
    """
    j = pl.program_id(1)
    n_pt = pl.num_programs(1)

    @pl.when(j == 0)
    def _():
        acc_ref[...] = jnp.zeros_like(acc_ref)

    x = pred_ref[0].astype(jnp.float32)             # (C, TP)
    lbl = lbl_ref[0]                                # (1, TP) int32
    c, tp = x.shape

    # numerically stable log-sum-exp over the class (sublane) axis
    m = jnp.max(x, axis=0, keepdims=True)           # (1, TP)
    lse = m + jnp.log(jnp.sum(jnp.exp(x - m), axis=0, keepdims=True))

    # logit of the true class via one-hot select (no dynamic gather on TPU)
    cls = lax.broadcasted_iota(jnp.int32, (c, tp), 0)
    picked = jnp.sum(jnp.where(cls == lbl, x, 0.0), axis=0, keepdims=True)

    nll = lse - picked                              # (1, TP), lane-dense

    if need_mask:
        # Only the last pixel tile can be ragged; keep the hot loop mask-free.
        is_last = j == n_pt - 1

        @pl.when(jnp.logical_not(is_last))
        def _():
            acc_ref[...] += nll

        @pl.when(is_last)
        def _():
            lane = lax.broadcasted_iota(jnp.int32, (1, tp), 1)
            valid = (j * tile_p + lane) < pixels
            # select (not multiply) so garbage logits in padded lanes can't leak
            acc_ref[...] += jnp.where(valid, nll, 0.0)
    else:
        acc_ref[...] += nll

    @pl.when(j == n_pt - 1)
    def _():
        out_ref[...] = jnp.sum(acc_ref[...]).reshape(1, 1, 1)


def cross_entropy_loss(pred, lbl, *, tile_pixels=2048):
    """Equivalent of CrossEntropyLoss.forward(pred, lbl).

    pred: (N, C, H, W) float logits (NCHW, as in PyTorch; f32 or bf16)
    lbl:  (N, H, W) or (N, 1, H, W) integer class labels
    Returns a scalar float32 mean cross-entropy loss.
    """
    if lbl.ndim == 4 and lbl.shape[1] == 1:
        lbl = lbl[:, 0, :, :]

    n, c, h, w = pred.shape
    p = h * w

    # free, contiguous views -- no transpose / pad / upcast HBM passes
    pred3 = pred.reshape(n, c, p)
    lbl3 = lbl.reshape(n, 1, p).astype(jnp.int32)

    tp_req = max(128, (int(tile_pixels) // 128) * 128)
    if p <= tp_req:
        tile_p, need_mask = p, False          # full-extent block (any alignment)
    else:
        tile_p, need_mask = tp_req, (p % tp_req != 0)
    n_pt = pl.cdiv(p, tile_p)

    kernel = functools.partial(
        _xent_kernel, pixels=p, tile_p=tile_p, need_mask=need_mask)

    per_image = pl.pallas_call(
        kernel,
        out_shape=jax.ShapeDtypeStruct((n, 1, 1), jnp.float32),
        grid_spec=pltpu.PrefetchScalarGridSpec(
            num_scalar_prefetch=0,
            grid=(n, n_pt),
            in_specs=[
                pl.BlockSpec((1, c, tile_p), lambda i, j: (i, 0, j)),
                pl.BlockSpec((1, 1, tile_p), lambda i, j: (i, 0, j)),
            ],
            out_specs=pl.BlockSpec((1, 1, 1), lambda i, j: (i, 0, 0)),
            scratch_shapes=[pltpu.VMEM((1, tile_p), jnp.float32)],
        ),
        compiler_params=pltpu.CompilerParams(
            # image axis is independent (sharded across TCs on multi-core chips),
            # pixel axis carries the per-image accumulator.
            dimension_semantics=("parallel", "arbitrary")),
    )(pred3, lbl3)

    return jnp.sum(per_image) / jnp.float32(n * p)


def _reference(pred, lbl):
    if lbl.ndim == 4 and lbl.shape[1] == 1:
        lbl = lbl[:, 0, :, :]
    n, c, h, w = pred.shape
    p2 = jnp.transpose(pred, (0, 2, 3, 1)).reshape(-1, c).astype(jnp.float32)
    l2 = lbl.reshape(-1).astype(jnp.int32)
    logp = jax.nn.log_softmax(p2, axis=-1)
    return -jnp.mean(jnp.take_along_axis(logp, l2[:, None], axis=-1))


if __name__ == "__main__":
    key = jax.random.PRNGKey(0)
    k1, k2 = jax.random.split(key)

    N, C, H, W = 2, 4, 16, 16
    pred = jax.random.normal(k1, (N, C, H, W), dtype=jnp.float32)
    # labels given as (N, 1, H, W) to exercise the squeeze branch of forward()
    lbl = jax.random.randint(k2, (N, 1, H, W), 0, C, dtype=jnp.int32)

    loss = cross_entropy_loss(pred, lbl)
    loss = jax.block_until_ready(loss)

    ref = _reference(pred, lbl)
    assert jnp.allclose(loss, ref, atol=1e-5, rtol=1e-5), (loss, ref)

    print("KERNEL_OK")
</pallas_src>

<mosaic_0001>
module attributes {stable_mosaic.version = 11 : i64} {
  func.func @_xent_kernel(%arg0: i32, %arg1: i32, %arg2: memref<1x4x256xf32, #tpu.memory_space<vmem>>, %arg3: memref<1x1x256xi32, #tpu.memory_space<vmem>>, %arg4: memref<1x1x1xf32, #tpu.memory_space<vmem>>, %arg5: memref<1x256xf32, #tpu.memory_space<vmem>>) attributes {dimension_semantics = [#tpu.dimension_semantics<parallel>, #tpu.dimension_semantics<arbitrary>], iteration_bounds = array<i64: 2, 1>, scalar_prefetch = 0 : i64, scratch_operands = 1 : i64, tpu.core_type = #tpu.core_type<tc>, window_params = [{transform_indices = @transform_0, window_bounds = array<i64: 1, 4, 256>}, {transform_indices = @transform_1, window_bounds = array<i64: 1, 1, 256>}, {transform_indices = @transform_2, window_bounds = array<i64: 1, 1, 1>}]} {
    %c0_i32 = arith.constant 0 : i32
    %0 = arith.cmpi eq, %arg1, %c0_i32 : i32
    %1 = arith.extui %0 : i1 to i32
    %c0_i32_0 = arith.constant 0 : i32
    %2 = arith.cmpi ne, %1, %c0_i32_0 : i32
    scf.if %2 {
      %cst_15 = arith.constant 0.000000e+00 : f32
      %30 = vector.broadcast %cst_15 : f32 to vector<1x256xf32>
      %c0_16 = arith.constant 0 : index
      %c0_17 = arith.constant 0 : index
      %31 = vector.load %arg5[%c0_16, %c0_17] : memref<1x256xf32, #tpu.memory_space<vmem>>, vector<1x256xf32>
      tpu.vector_store %arg5[%c0_16, %c0_17], %30 {strides = array<i32>} : memref<1x256xf32, #tpu.memory_space<vmem>>, vector<1x256xf32>,
    } else {
    }
    %c0 = arith.constant 0 : index
    %c0_1 = arith.constant 0 : index
    %c0_2 = arith.constant 0 : index
    %3 = vector.load %arg2[%c0, %c0_1, %c0_2] : memref<1x4x256xf32, #tpu.memory_space<vmem>>, vector<1x4x256xf32>
    %4 = vector.shape_cast %3 : vector<1x4x256xf32> to vector<4x256xf32>
    %c0_3 = arith.constant 0 : index
    %c0_4 = arith.constant 0 : index
    %c0_5 = arith.constant 0 : index
    %5 = vector.load %arg3[%c0_3, %c0_4, %c0_5] : memref<1x1x256xi32, #tpu.memory_space<vmem>>, vector<1x1x256xi32>
    %6 = vector.shape_cast %5 : vector<1x1x256xi32> to vector<1x256xi32>
    %cst = arith.constant dense<0xFF800000> : vector<256xf32>
    %7 = vector.multi_reduction <maximumf>, %4, %cst [0] : vector<4x256xf32> to vector<256xf32>
    %8 = vector.shape_cast %7 : vector<256xf32> to vector<1x256xf32>
    %9 = vector.broadcast %8 : vector<1x256xf32> to vector<4x256xf32>
    %10 = arith.subf %4, %9 : vector<4x256xf32>
    %11 = math.exp %10 : vector<4x256xf32>
    %cst_6 = arith.constant dense<0.000000e+00> : vector<256xf32>
    %12 = vector.multi_reduction <add>, %11, %cst_6 [0] : vector<4x256xf32> to vector<256xf32>
    %13 = vector.shape_cast %12 : vector<256xf32> to vector<1x256xf32>
    %14 = math.log %13 : vector<1x256xf32>
    %15 = arith.addf %8, %14 : vector<1x256xf32>
    %16 = tpu.iota {dimensions = array<i32: 0>} : vector<4x256xi32>
    %17 = vector.broadcast %6 : vector<1x256xi32> to vector<4x256xi32>
    %18 = arith.cmpi eq, %16, %17 : vector<4x256xi32>
    %cst_7 = arith.constant 0.000000e+00 : f32
    %19 = vector.broadcast %cst_7 : f32 to vector<4x256xf32>
    %20 = arith.select %18, %4, %19 : vector<4x256xi1>, vector<4x256xf32>
    %cst_8 = arith.constant dense<0.000000e+00> : vector<256xf32>
    %21 = vector.multi_reduction <add>, %20, %cst_8 [0] : vector<4x256xf32> to vector<256xf32>
    %22 = vector.shape_cast %21 : vector<256xf32> to vector<1x256xf32>
    %23 = arith.subf %15, %22 : vector<1x256xf32>
    %c0_9 = arith.constant 0 : index
    %c0_10 = arith.constant 0 : index
    %24 = vector.load %arg5[%c0_9, %c0_10] : memref<1x256xf32, #tpu.memory_space<vmem>>, vector<1x256xf32>
    %25 = arith.addf %24, %23 : vector<1x256xf32>
    %c0_11 = arith.constant 0 : index
    %c0_12 = arith.constant 0 : index
    %26 = vector.load %arg5[%c0_11, %c0_12] : memref<1x256xf32, #tpu.memory_space<vmem>>, vector<1x256xf32>
    tpu.vector_store %arg5[%c0_11, %c0_12], %25 {strides = array<i32>} : memref<1x256xf32, #tpu.memory_space<vmem>>, vector<1x256xf32>,
    %c0_i32_13 = arith.constant 0 : i32
    %27 = arith.cmpi eq, %arg1, %c0_i32_13 : i32
    %28 = arith.extui %27 : i1 to i32
    %c0_i32_14 = arith.constant 0 : i32
    %29 = arith.cmpi ne, %28, %c0_i32_14 : i32
    scf.if %29 {
      %c0_15 = arith.constant 0 : index
      %c0_16 = arith.constant 0 : index
      %30 = vector.load %arg5[%c0_15, %c0_16] : memref<1x256xf32, #tpu.memory_space<vmem>>, vector<1x256xf32>
      %31 = vector.shape_cast %30 : vector<1x256xf32> to vector<1x1x256xf32>
      %cst_17 = arith.constant dense<0.000000e+00> : vector<1xf32>
      %32 = vector.multi_reduction <add>, %31, %cst_17 [1, 2] : vector<1x1x256xf32> to vector<1xf32>
      %33 = vector.shape_cast %32 : vector<1xf32> to vector<1x1x1xf32>
      %34 = vector.extract %33[0, 0, 0] : f32 from vector<1x1x1xf32>
      %35 = vector.broadcast %34 : f32 to vector<1x1x1xf32>
      %c0_18 = arith.constant 0 : index
      %c0_19 = arith.constant 0 : index
      %c0_20 = arith.constant 0 : index
      %36 = vector.load %arg4[%c0_18, %c0_19, %c0_20] : memref<1x1x1xf32, #tpu.memory_space<vmem>>, vector<1x1x1xf32>
      tpu.vector_store %arg4[%c0_18, %c0_19, %c0_20], %35 {strides = array<i32>} : memref<1x1x1xf32, #tpu.memory_space<vmem>>, vector<1x1x1xf32>,
    } else {
    }
    return
  }
  func.func @transform_0(%arg0: i32, %arg1: i32) -> (i32, i32, i32) {
    %c0_i32 = arith.constant 0 : i32
    %c0_i32_0 = arith.constant 0 : i32
    return %arg0, %c0_i32, %arg1 : i32, i32, i32
  }
  func.func @transform_1(%arg0: i32, %arg1: i32) -> (i32, i32, i32) {
    %c0_i32 = arith.constant 0 : i32
    %c0_i32_0 = arith.constant 0 : i32
    return %arg0, %c0_i32, %arg1 : i32, i32, i32
  }
  func.func @transform_2(%arg0: i32, %arg1: i32) -> (i32, i32, i32) {
    %c0_i32 = arith.constant 0 : i32
    %c0_i32_0 = arith.constant 0 : i32
    %c0_i32_1 = arith.constant 0 : i32
    return %arg0, %c0_i32, %c0_i32_0 : i32, i32, i32
  }
}

</mosaic_0001>

<bundles_post_ra>
// kernel: tpu_custom_call.1
= control target key start
LH: loop header
LB: loop body
LE: loop exit
PB: predicated region body
PF: predicated region fallthrough
CT: control target
= control target key end

     0   :  { %7 = vsyncpa [#allocation4], 0  ;;  %s827_s0 = inlined_call_operand.hbm [shape: f32[2,4,256], index: 0, kind: input, shape index: {}]   ;;  %s828_s1 = inlined_call_operand.hbm [shape: s32[2,1,256], index: 1, kind: input, shape index: {}]   ;;  %s829_s2 = inlined_call_operand.vmem [shape: f32[2,1,1], index: 2, kind: output, shape index: {}]  }
   0x1   :  { %9 = vsyncpa [#allocation4 + $0x1], 0 }
   0x2   :  { %10 = vsyncpa [#allocation6], 0 }
   0x3   :  { %12 = vsyncpa [#allocation6 + $0x1], 0  ;;  %s678_s9 = smov 0   ;;  %s680_s10 = smov 0  }
   0x4   :  { %s682_s11 = smov 0   ;;  %s684_s12 = smov 0  }
   0x5   :  { %s686_s13 = smov 0   ;;  %s688_s14 = smov 0  }
   0x6 LB: > { %s459_s15 = sadd.s32 4294967295, %s657_s14   ;;  %s30_s16 = sadd.s32 1, %s653_s13  ;;  %s657_s14 = sphi %s688_s14, %s18_s14   ;;  %s653_s13 = sphi %s686_s13, %s840_s13   ;;  %s649_s12 = sphi %s684_s12, %s839_s12   ;;  %s645_s11 = sphi %s682_s11, %s838_s11   ;;  %s641_s10 = sphi %s680_s10, %s837_s10   ;;  %s637_s9 = sphi %s678_s9, %s836_s9  }
   0x7   : > { %p32_p0 = scmp.ge.s32.totalorder %s30_s16, 2  ;;  %s39_s17 = sadd.s32 1, %s645_s11 }
   0x8   : > { %p46_p1 = scmp.ne.s32.totalorder %s645_s11, %s641_s10  ;;  %p47_p2 = scmp.eq.s32.totalorder %s657_s14, 0 }
   0x9   : > { %s842_s16 = smov (%p32_p0, %s30_s16), 0  ;;  %p52_p4 = scmp.ne.s32.totalorder %s641_s10, %s637_s9 }
   0xa   : > { %p714_p3 = por %p47_p2, %p46_p1  ;;  %s34_s19 = ssub.s32 %s653_s13, %s842_s16 }
   0xb   : > { %p53_p5 = scmp.eq.s32.totalorder %s459_s15, 0  ;;  %p37_p6 = scmp.eq.s32.totalorder %s34_s19, 0 }
   0xc   : > { %p489_p8 = scmp.lt.s32.totalorder %s657_s14, 2  ;;  %s730_s22 = sand.u32 1, %s645_s11  }
   0xd   : > { %p721_p7 = por %p53_p5, %p52_p4  ;;  %s474_s23 = sshll.u32 %s653_s13, 7 }
   0xe   : > { %s727_s21 = scalar_select %p37_p6, %s645_s11, %s39_s17  }
   0xf   : > { %s463_s24 = sshll.u32 %s730_s22, 3  ;;  %s142_s27 = scalar_lea.hbm %s827_s0, %s474_s23 }
  0x10   : > { %s134_s28 = scalar_lea.vmem [#allocation3], %s463_s24  ;;  %p739_p9 = pnand %p489_p8, %p714_p3 }
  0x11   : > { %s144_s29 = sshll.u32 %s134_s28, 4  ;;  %p469_p10 = scmp.ge.s32.totalorder %s657_s14, 1  ;;  %s145_s29 = int_to_ptr.vmem [resolvable:$true] %s144_s29 }
  0x12   : > { %p170_p11 = scmp.lt.s32.totalorder %s657_s14, 3  ;;  %s131_s3 = scalar_lea.sflag [#allocation4], %s730_s22 }
  0x13   : > { %p549_p12 = pneg %p739_p9  ;;  %s560_s4 = scalar_lea.vmem %s145_s29, 128 }
  0x14   : > { %p561_p13 = scmp.ne.s32.totalorder %s145_s29, %s560_s4  ;;  %s659_s5 = smov [#allocation3]  }
  0x15   : > { %s565_s6 = sshll.u32 %s659_s5, 4  ;;  %s566_s6 = int_to_ptr.vmem [resolvable:$false] %s565_s6 }
  0x16   : > { %p563_p0 = pnand %p561_p13, %p549_p12  ;;  %s567_s7 = scalar_lea.vmem %s566_s6, 256 }
  0x17   : > { %p568_p2 = scmp.lt.s32.totalorder %s145_s29, %s566_s6  ;;  %p569_p3 = scmp.lt.s32.totalorder %s567_s7, %s560_s4 }
  0x18   : > { %p564_p1 = pneg %p563_p0 }
  0x19   : > { %p570_p4 = por %p569_p3, %p568_p2 }
  0x1b   : > { %p571_p5 = pnand %p570_p4, %p564_p1 }
  0x1d   : > { %574 = shalt.err (!%p571_p5)
}
  0x1e   : > { %485 = dma.hbm_to_vmem [thread:$0]  (!%p739_p9), %s142_s27, 128, %s145_s29, %s131_s3  }
  0x1f   : > { %p757_p6 = pnand %p469_p10, %p170_p11  ;;  %s466_s9 = sshll.u32 %s730_s22, 1 }
  0x20   : > { %s475_s15 = sshll.u32 %s653_s13, 5  ;;  %s155_s23 = scalar_lea.vmem [#allocation5], %s466_s9 }
  0x21   : > { %s163_s19 = scalar_lea.hbm %s828_s1, %s475_s15  ;;  %s165_s24 = sshll.u32 %s155_s23, 4  ;;  %s166_s24 = int_to_ptr.vmem [resolvable:$true] %s165_s24 }
  0x22   : > { %s152_s25 = scalar_lea.sflag [#allocation6], %s730_s22  ;;  %s588_s26 = scalar_lea.vmem %s166_s24, 32 }
  0x23   : > { %p589_p8 = scmp.ne.s32.totalorder %s166_s24, %s588_s26  ;;  %s660_s27 = smov [#allocation5]  }
  0x24   : > { %s593_s28 = sshll.u32 %s660_s27, 4  ;;  %s594_s28 = int_to_ptr.vmem [resolvable:$false] %s593_s28 }
  0x25   : > { %p591_p13 = pnand %p589_p8, %p549_p12  ;;  %s595_s29 = scalar_lea.vmem %s594_s28, 64 }
  0x26   : > { %p596_p10 = scmp.lt.s32.totalorder %s166_s24, %s594_s28  ;;  %p597_p11 = scmp.lt.s32.totalorder %s595_s29, %s588_s26 }
  0x27   : > { %p592_p0 = pneg %p591_p13 }
  0x28   : > { %p598_p1 = por %p597_p11, %p596_p10 }
  0x2a   : > { %p599_p2 = pnand %p598_p1, %p592_p0 }
  0x2c   : > { %602 = shalt.err (!%p599_p2)
}
  0x2d   : > { %488 = dma.hbm_to_vmem [thread:$0]  (!%p739_p9), %s163_s19, 32, %s166_s24, %s152_s25  }
  0x2e   : > { %174 = sbr.rel (%p757_p6) target bundleno = 349 (0x15d), region = 28  ;;  %s176_s22 = sand.u32 (!%p757_p6), 1, %s641_s10  }
  0x2f   : > { %s470_s3 = sshll.u32 (!%p757_p6), %s176_s22, 3  ;;  %s177_s4 = scalar_lea.sflag (!%p757_p6), [#allocation4], %s176_s22 }
  0x30   : > { %s180_s5 = scalar_lea.vmem (!%p757_p6), [#allocation3], %s470_s3 }
  0x33   : > { %628 = dma.done.wait (%p721_p7), %s177_s4, 128  }
  0x34   : > { %630 = vsyncadd (%p721_p7), %s177_s4, 4294967168  ;;  %s471_s6 = sshll.u32 %s176_s22, 1  ;;  %s186_s7 = scalar_lea.sflag [#allocation6], %s176_s22 }
  0x35   : > { %s189_s9 = scalar_lea.vmem [#allocation5], %s471_s6 }
  0x36   : > { %632 = dma.done.wait (%p721_p7), %s186_s7, 32  }
  0x37   : > { %634 = vsyncadd (%p721_p7), %s186_s7, 4294967264  ;;  %v222_v0 = vlaneseq  ;;  %v661_v2 = vmov 0.0   ;;  %vm232_vm1 = vcmask 1043456   ;;  %v227_v3 = vld [vmem:[%s180_s5] sm:$0xff]  ;;  %v228_v24 = vld [vmem:[%s189_s9] sm:$0x3] }
  0x38   : > { %v230_v4 = vcombine.high %v227_v3, %v227_v3  ;;  %v233_v5 = vsel %vm232_vm1, %v227_v3, -inf  ;;  %v662_v58 = vmov 1966171168   ;;  %vm347_vm4 = vcmask 1040384   ;;  %p215_p7 = scmp.lt.s32.totalorder %s649_s12, 1 }
  0x39   : > { %vm783_vm0 = vcmp.lt.s32.totalorder %v222_v0, 256  ;;  %v234_v6 = vrot.slane %v233_v5, 4  ;;  %v791_v22 = vshrl.u32 %v222_v0, 7  ;;  %v312_v59 = vunpack.c.l.s4 %v662_v58 }
  0x3a   : > { %226 = vst.msk [vmem:[#allocation2] sm:$0x3] %vm783_vm0, %v661_v2  ;;  %v240_v7 = vsel %vm232_vm1, %v230_v4, -inf  ;;  %s844_s12 = smov (!%p215_p7, %s649_s12), 1  ;;  %vm361_vm5 = vcmask 0  }
  0x3b   : > { %v235_v8 = vmax.f32 %v233_v5, %v234_v6  ;;  %v241_v9 = vrot.slane %v240_v7, 4  ;;  %v281_v23 = vsub.s32 0, %v791_v22  ;;  %v285_v25 = vsub.s32 1, %v791_v22  ;;  %s217_s8 = scalar_lea.vmem %s829_s2, %s844_s12 }
  0x3d   : > { %v236_v10 = vrot.slane %v235_v8, 2  ;;  %v242_v11 = vmax.f32 %v240_v7, %v241_v9  ;;  %v282_v26 = vrot.slane %v228_v24, %v281_v23  ;;  %v286_v27 = vrot.slane %v228_v24, %v285_v25 }
  0x3f   : > { %v237_v12 = vmax.f32 %v235_v8, %v236_v10  ;;  %v243_v13 = vrot.slane %v242_v11, 2  ;;  %vm287_vm2 = vcmp.eq.s32.totalorder %v791_v22, %v282_v26  ;;  %vm288_vm3 = vcmp.eq.s32.totalorder %v791_v22, %v286_v27 }
  0x40   : > { %v289_v32 = vsel %vm287_vm2, %v227_v3, 0.0  ;;  %v290_v36 = vsel %vm288_vm3, %v230_v4, 0.0  ;;  %v313_v4 = vunpack.c.0.s8 %v312_v59 }
  0x41   : > { %v238_v14 = vrot.slane %v237_v12, 1  ;;  %v244_v15 = vmax.f32 %v242_v11, %v243_v13  ;;  %v291_v37 = vsel %vm232_vm1, %v289_v32, 0.0  ;;  %v298_v40 = vsel %vm232_vm1, %v290_v36, 0.0  ;;  %v307_v11 = vld [vmem:[#allocation2] sm:$0x3] }
  0x42   : > { %v292_v43 = vrot.slane %v291_v37, 4  ;;  %v299_v46 = vrot.slane %v298_v40, 4  ;;  %v316_v8 = vsub.s32 %v313_v4, %v791_v22 }
  0x43   : > { %v239_v16 = vmax.f32 %v237_v12, %v238_v14  ;;  %v245_v17 = vrot.slane %v244_v15, 1 }
  0x44   : > { %v293_v49 = vadd.f32 %v292_v43, %v291_v37  ;;  %v300_v51 = vadd.f32 %v299_v46, %v298_v40 }
  0x45   : > { %v246_v18 = vmax.f32 %v244_v15, %v245_v17 }
  0x46   : > { %v294_v52 = vrot.slane %v293_v49, 2  ;;  %v301_v53 = vrot.slane %v300_v51, 2 }
  0x47   : > { %v249_v19 = vcombine.low %v239_v16, %v246_v18 }
  0x48   : > { %v295_v54 = vadd.f32 %v294_v52, %v293_v49  ;;  %v302_v55 = vadd.f32 %v301_v53, %v300_v51 }
  0x49   : > { %v251_v20 = vsub.f32 %v227_v3, %v249_v19 }
  0x4a   : > { %v296_v56 = vrot.slane %v295_v54, 1  ;;  %v303_v57 = vrot.slane %v302_v55, 1 }
  0x4b   : > { %v252_v21 = vmul.f32 1.442695, %v251_v20 }
  0x4c   : > { %v297_v62 = vadd.f32 %v296_v56, %v295_v54  ;;  %v304_v3 = vadd.f32 %v303_v57, %v302_v55 }
  0x4d   : > { %541 = vpow2.f32 %v252_v21 }
  0x5a   : > { %v542_v28 = vpop.eup %541 }
  0x5b   : > { %v255_v29 = vcombine.high %v542_v28, %v542_v28  ;;  %v257_v30 = vsel %vm232_vm1, %v542_v28, 0.0 }
  0x5c   : > { %v258_v31 = vrot.slane %v257_v30, 4 }
  0x5d   : > { %v264_v33 = vsel %vm232_vm1, %v255_v29, 0.0 }
  0x5e   : > { %v259_v34 = vadd.f32 %v258_v31, %v257_v30  ;;  %v265_v35 = vrot.slane %v264_v33, 4 }
  0x60   : > { %v260_v38 = vrot.slane %v259_v34, 2  ;;  %v266_v39 = vadd.f32 %v265_v35, %v264_v33 }
  0x62   : > { %v261_v41 = vadd.f32 %v260_v38, %v259_v34  ;;  %v267_v42 = vrot.slane %v266_v39, 2 }
  0x64   : > { %v262_v44 = vrot.slane %v261_v41, 1  ;;  %v268_v45 = vadd.f32 %v267_v42, %v266_v39 }
  0x66   : > { %v263_v47 = vadd.f32 %v262_v44, %v261_v41  ;;  %v269_v48 = vrot.slane %v268_v45, 1 }
  0x68   : > { %v270_v50 = vadd.f32 %v269_v48, %v268_v45  ;;  %543 = vlog2.f32 %v263_v47 }
  0x6a   : > { %545 = vlog2.f32 %v270_v50 }
  0x75   : > { %v544_v60 = vpop.eup %543 }
  0x76   : > { %v272_v61 = vmul.f32 0.6931472, %v544_v60 }
  0x77   : > { %v546_v63 = vpop.eup %545 }
  0x78   : > { %v274_v0 = vmul.f32 0.6931472, %v546_v63  ;;  %v275_v2 = vadd.f32 %v272_v61, %v239_v16 }
  0x7a   : > { %v276_v5 = vadd.f32 %v274_v0, %v246_v18  ;;  %v305_v6 = vsub.f32 %v275_v2, %v297_v62 }
  0x7c   : > { %v306_v7 = vsub.f32 %v276_v5, %v304_v3 }
  0x7e   : > { %v310_v9 = vcombine.low %v305_v6, %v306_v7 }
  0x80   : > { %v317_v10 = vrot.slane %v310_v9, %v316_v8 }
  0x82   : > { %v324_v12 = vrot.slane %v317_v10, %v316_v8 }
  0x84   : > { %v326_v13 = vadd.f32 %v324_v12, %v307_v11 }
  0x86   : > { %331 = vst.msk [vmem:[#allocation2] sm:$0x3] %vm783_vm0, %v326_v13 }
  0x8d   : > { %v335_v14 = vld [vmem:[#allocation2] sm:$0x3] }
  0x8e   : > { %v340_v15 = vrot.slane %v335_v14, %v281_v23  ;;  %v344_v16 = vrot.slane %v335_v14, %v285_v25 }
  0x90   : > { %v348_v17 = vsel %vm347_vm4, %v340_v15, 0.0  ;;  %v349_v18 = vsel %vm347_vm4, %v344_v16, 0.0 }
  0x91   : > { %v350_v19 = vadd.f32 %v349_v18, %v348_v17 }
  0x93   : > { %351 = vadd.xlane.f32.xlu0 %v350_v19 }
 0x11c   : > { %v352_v20 = vpop.xlane.xlu0 %351 }
 0x11d   : > { %v353_v21 = vrot.slane %v352_v20, 4 }
 0x11f   : > { %v354_v22 = vadd.f32 %v353_v21, %v352_v20 }
 0x121   : > { %v355_v24 = vrot.slane %v354_v22, 2 }
 0x123   : > { %v356_v26 = vadd.f32 %v355_v24, %v354_v22 }
 0x125   : > { %v357_v27 = vrot.slane %v356_v26, 1 }
 0x127   : > { %v358_v28 = vadd.f32 %v357_v27, %v356_v26 }
 0x129   : > { %476 = vpush %v358_v28 }
 0x15a   : > { %s477_s15 = spop %476 }
 0x15b   : > { %v360_v1 = vstv %s477_s15 }
 0x15c   : > { %362 = vst.msk [vmem:[%s217_s8] sm:$0x1] %vm361_vm5, %v360_v1 }
 0x15d PF: > { %s18_s14 = sadd.s32 1, %s657_s14   ;;  %s836_s9 = smov %s641_s10 }
 0x15e   : > { %p15_p9 = scmp.ge.s32.totalorder %s18_s14, 4   ;;  %s837_s10 = smov %s645_s11 }
 0x15f   : > { %s838_s11 = smov %s727_s21  ;;  %s839_s12 = smov %s653_s13 }
 0x160   : > { %s840_s13 = smov %s842_s16  ;;  %17 = sbr.rel (!%p15_p9) target bundleno = 6 (0x6), region = 89 }
 0x165   :  { %380 = vsyncpa [#allocation4], 1 }
 0x166   :  { %382 = vsyncpa [#allocation4 + $0x1], 1 }
 0x167   :  { %383 = vsyncpa [#allocation6], 1 }
 0x168   :  { %385 = vsyncpa [#allocation6 + $0x1], 1 }

</bundles_post_ra>
